<compile_context>
chip_gen: v6e
topology: v6e:2x2x1
jax: 0.10.0
libtpu: 0.0.40
codegen_flags: <defaults>
</compile_context>

<pallas_src>
import jax
import jax.numpy as jnp
from jax.experimental import pallas as pl
from jax.experimental.pallas import tpu as pltpu

HEAD_PAD = 128   # fused rot(6) + trans(3) head, zero-padded to a full lane width
HIDDEN1 = 256
HIDDEN2 = 128


def _round_up(n, m):
    return -(-n // m) * m


def _sublane(dtype):
    # Sublane packing granularity: 8 rows for 32-bit dtypes, 16 for 16-bit.
    return 8 * (4 // jnp.dtype(dtype).itemsize)


def regressor_kernel(x_ref, w1_ref, c1_ref, w2_ref, c2_ref, wh_ref, ch_ref, out_ref):
    cdt = w1_ref.dtype  # MXU operand dtype (f32 or bf16); accumulation is f32

    # fc block 1: (folded Linear+BN) -> LeakyReLU(0.2)
    h = jnp.dot(x_ref[...], w1_ref[...], preferred_element_type=jnp.float32)
    h = h + c1_ref[...]
    h = jnp.maximum(h, 0.2 * h)            # single VALU op (slope < 1)

    # fc block 2: (folded Linear+BN) -> LeakyReLU(0.2)
    h = jnp.dot(h.astype(cdt), w2_ref[...], preferred_element_type=jnp.float32)
    h = h + c2_ref[...]
    h = jnp.maximum(h, 0.2 * h)

    # fused heads: single (128 -> 128) matmul; lanes 0:6 = rot, 6:9 = trans
    head = jnp.dot(h.astype(cdt), wh_ref[...], preferred_element_type=jnp.float32)
    head = head + ch_ref[...]

    # L2-normalize the rotation lanes only (matches torch.norm(dim=1)); rsqrt -> EUP.
    # NOTE: a row whose six rot outputs are exactly zero yields inf, matching the
    # PyTorch reference's divide-by-zero; padded rows are sliced off by the wrapper.
    lane = jax.lax.broadcasted_iota(jnp.int32, head.shape, 1)
    quat_mask = lane < 6
    sumsq = jnp.sum(jnp.where(quat_mask, head * head, 0.0), axis=1, keepdims=True)
    inv_norm = jax.lax.rsqrt(sumsq)
    out_ref[...] = jnp.where(quat_mask, head * inv_norm, head).astype(out_ref.dtype)


def fold_params(raw, eps=1e-5, compute_dtype=jnp.float32):
    """Fold BN (eval) + Linear bias into the weights; fuse the two heads.

    Weights are cast to `compute_dtype` (f32 or bf16) for the MXU matmuls; the
    folded additive constants stay f32 (applied after f32 accumulation).
    """
    s1 = raw["g1"] / jnp.sqrt(raw["v1"] + eps)
    c1 = raw["be1"] - s1 * raw["m1"] + raw["b1"] * s1
    w1f = raw["w1"] * s1                       # (in, 256) * (1, 256)

    s2 = raw["g2"] / jnp.sqrt(raw["v2"] + eps)
    c2 = raw["be2"] - s2 * raw["m2"] + raw["b2"] * s2
    w2f = raw["w2"] * s2                       # (256, 128) * (1, 128)

    wh = jnp.zeros((HIDDEN2, HEAD_PAD), jnp.float32)
    wh = wh.at[:, 0:6].set(raw["wr"]).at[:, 6:9].set(raw["wt"])
    ch = jnp.zeros((1, HEAD_PAD), jnp.float32)
    ch = ch.at[:, 0:6].set(raw["br"]).at[:, 6:9].set(raw["bt"])

    cd = jnp.dtype(compute_dtype)
    return dict(w1f=w1f.astype(cd), c1=c1, w2f=w2f.astype(cd), c2=c2,
                wh=wh.astype(cd), ch=ch)


def regressor_6d_forward(x, fp, *, tb=None, out_dtype=jnp.float32):
    """x: (B, 2*pc_feat_dim). Returns (quat (B,6), trans (B,3,1)) in out_dtype."""
    B, in_dim = x.shape
    compute_dtype = fp["w1f"].dtype
    out_dtype = jnp.dtype(out_dtype)
    x = x.astype(compute_dtype)

    sub = max(_sublane(compute_dtype), _sublane(out_dtype))
    if tb is None:
        # Big tiles amortize per-grid-step overhead; keep >= 2 grid steps when
        # possible so "parallel" can shard across the two v7x TensorCores.
        tb = min(1024, _round_up(max(pl.cdiv(B, 2), 1), sub))
    B_pad = _round_up(B, tb)
    if B_pad != B:
        x = jnp.pad(x, ((0, B_pad - B), (0, 0)))

    # Advisory cost hint so XLA can overlap this small call with surrounding HLO.
    flops = 2 * B_pad * (in_dim * HIDDEN1 + HIDDEN1 * HIDDEN2 + HIDDEN2 * HEAD_PAD)
    param_bytes = sum(int(v.size) * v.dtype.itemsize for v in fp.values())
    bytes_accessed = (B_pad * in_dim * jnp.dtype(compute_dtype).itemsize
                      + B_pad * HEAD_PAD * out_dtype.itemsize
                      + param_bytes)

    resident = lambda i: (0, 0)                # weights: same block every grid step
    out = pl.pallas_call(
        regressor_kernel,
        out_shape=jax.ShapeDtypeStruct((B_pad, HEAD_PAD), out_dtype),
        grid=(B_pad // tb,),
        in_specs=[
            pl.BlockSpec((tb, in_dim), lambda i: (i, 0)),
            pl.BlockSpec(fp["w1f"].shape, resident),
            pl.BlockSpec(fp["c1"].shape, resident),
            pl.BlockSpec(fp["w2f"].shape, resident),
            pl.BlockSpec(fp["c2"].shape, resident),
            pl.BlockSpec(fp["wh"].shape, resident),
            pl.BlockSpec(fp["ch"].shape, resident),
        ],
        out_specs=pl.BlockSpec((tb, HEAD_PAD), lambda i: (i, 0)),
        compiler_params=pltpu.CompilerParams(
            dimension_semantics=("parallel",),
            vmem_limit_bytes=32 * 1024 * 1024),
        cost_estimate=pl.CostEstimate(
            flops=int(flops),
            transcendentals=int(B_pad),
            bytes_accessed=int(bytes_accessed)),
    )(x, fp["w1f"], fp["c1"], fp["w2f"], fp["c2"], fp["wh"], fp["ch"])

    quat = out[:B, :6]
    trans = out[:B, 6:9][:, :, None]
    return quat, trans


def init_params(key, pc_feat_dim):
    """Deterministic synthetic parameters matching the PyTorch module shapes.

    Linear weights are stored as (in_features, out_features); biases and BN
    stats as (1, out_features) for lane broadcasting.
    """
    in_dim = 2 * pc_feat_dim
    ks = jax.random.split(key, 16)

    def lin(kw, kb, fan_in, fan_out):
        w = jax.random.normal(kw, (fan_in, fan_out), jnp.float32) / jnp.sqrt(fan_in)
        b = jax.random.normal(kb, (1, fan_out), jnp.float32) * 0.01
        return w, b

    def bn_stats(kg, kb, km, kv, dim):
        g = 1.0 + 0.1 * jax.random.normal(kg, (1, dim), jnp.float32)
        be = 0.1 * jax.random.normal(kb, (1, dim), jnp.float32)
        m = 0.1 * jax.random.normal(km, (1, dim), jnp.float32)
        v = jnp.abs(1.0 + 0.1 * jax.random.normal(kv, (1, dim), jnp.float32))
        return g, be, m, v

    w1, b1 = lin(ks[0], ks[1], in_dim, HIDDEN1)
    g1, be1, m1, v1 = bn_stats(ks[2], ks[3], ks[4], ks[5], HIDDEN1)
    w2, b2 = lin(ks[6], ks[7], HIDDEN1, HIDDEN2)
    g2, be2, m2, v2 = bn_stats(ks[8], ks[9], ks[10], ks[11], HIDDEN2)
    wr, br = lin(ks[12], ks[13], HIDDEN2, 6)
    wt, bt = lin(ks[14], ks[15], HIDDEN2, 3)

    return dict(w1=w1, b1=b1, g1=g1, be1=be1, m1=m1, v1=v1,
                w2=w2, b2=b2, g2=g2, be2=be2, m2=m2, v2=v2,
                wr=wr, br=br, wt=wt, bt=bt)


def _reference(x, raw, eps=1e-5):
    """Pure-JAX reference: unfolded Linear -> BN(eval) -> LeakyReLU, two heads."""
    def bn(z, g, be, m, v):
        return (z - m) / jnp.sqrt(v + eps) * g + be

    h = jnp.dot(x, raw["w1"]) + raw["b1"]
    h = bn(h, raw["g1"], raw["be1"], raw["m1"], raw["v1"])
    h = jnp.where(h > 0, h, 0.2 * h)
    h = jnp.dot(h, raw["w2"]) + raw["b2"]
    h = bn(h, raw["g2"], raw["be2"], raw["m2"], raw["v2"])
    h = jnp.where(h > 0, h, 0.2 * h)
    q = jnp.dot(h, raw["wr"]) + raw["br"]
    q = q / jnp.linalg.norm(q, axis=1, keepdims=True)
    t = jnp.dot(h, raw["wt"]) + raw["bt"]
    return q, t[:, :, None]


if __name__ == "__main__":
    pc_feat_dim = 32
    key = jax.random.PRNGKey(0)
    kx, kp, kx2 = jax.random.split(key, 3)
    raw = init_params(kp, pc_feat_dim)

    # --- f32 path, B not a multiple of 8 (exercises padding; grid has 2 steps) ---
    B = 10
    x = jax.random.normal(kx, (B, 2 * pc_feat_dim), jnp.float32)
    folded_f32 = fold_params(raw, compute_dtype=jnp.float32)
    quat, trans = regressor_6d_forward(x, folded_f32, out_dtype=jnp.float32)
    jax.block_until_ready((quat, trans))
    q_ref, t_ref = _reference(x, raw)
    assert quat.shape == (B, 6) and trans.shape == (B, 3, 1)
    assert jnp.allclose(quat, q_ref, atol=1e-4, rtol=1e-4)
    assert jnp.allclose(trans, t_ref, atol=1e-4, rtol=1e-4)

    # --- multi-grid-step f32 check (exercises the batch index_map) ---
    B2 = 40
    x2 = jax.random.normal(kx2, (B2, 2 * pc_feat_dim), jnp.float32)
    quat2, trans2 = regressor_6d_forward(x2, folded_f32, out_dtype=jnp.float32)
    jax.block_until_ready((quat2, trans2))
    q_ref2, t_ref2 = _reference(x2, raw)
    assert quat2.shape == (B2, 6) and trans2.shape == (B2, 3, 1)
    assert jnp.allclose(quat2, q_ref2, atol=1e-4, rtol=1e-4)
    assert jnp.allclose(trans2, t_ref2, atol=1e-4, rtol=1e-4)

    # --- bf16 fast path: bf16 MXU operands + bf16 output slab (loose tolerance) ---
    folded_bf16 = fold_params(raw, compute_dtype=jnp.bfloat16)
    quat_b, trans_b = regressor_6d_forward(x, folded_bf16, out_dtype=jnp.bfloat16)
    jax.block_until_ready((quat_b, trans_b))
    assert quat_b.dtype == jnp.bfloat16 and trans_b.dtype == jnp.bfloat16
    assert jnp.allclose(quat_b.astype(jnp.float32), q_ref, atol=8e-2, rtol=8e-2)
    assert jnp.allclose(trans_b.astype(jnp.float32), t_ref, atol=8e-2, rtol=8e-2)

    print("KERNEL_OK")
</pallas_src>

<mosaic_0001>
module attributes {stable_mosaic.version = 11 : i64} {
  func.func @regressor_kernel(%arg0: i32, %arg1: memref<8x64xf32, #tpu.memory_space<vmem>>, %arg2: memref<64x256xf32, #tpu.memory_space<vmem>>, %arg3: memref<1x256xf32, #tpu.memory_space<vmem>>, %arg4: memref<256x128xf32, #tpu.memory_space<vmem>>, %arg5: memref<1x128xf32, #tpu.memory_space<vmem>>, %arg6: memref<128x128xf32, #tpu.memory_space<vmem>>, %arg7: memref<1x128xf32, #tpu.memory_space<vmem>>, %arg8: memref<8x128xf32, #tpu.memory_space<vmem>>) attributes {dimension_semantics = [#tpu.dimension_semantics<parallel>], iteration_bounds = array<i64: 2>, scalar_prefetch = 0 : i64, scratch_operands = 0 : i64, tpu.core_type = #tpu.core_type<tc>, window_params = [{transform_indices = @transform_0, window_bounds = array<i64: 8, 64>}, {pipeline_mode = #tpu.pipeline_mode<synchronous>, transform_indices = @transform_1, window_bounds = array<i64: 64, 256>}, {pipeline_mode = #tpu.pipeline_mode<synchronous>, transform_indices = @transform_2, window_bounds = array<i64: 1, 256>}, {pipeline_mode = #tpu.pipeline_mode<synchronous>, transform_indices = @transform_3, window_bounds = array<i64: 256, 128>}, {pipeline_mode = #tpu.pipeline_mode<synchronous>, transform_indices = @transform_4, window_bounds = array<i64: 1, 128>}, {pipeline_mode = #tpu.pipeline_mode<synchronous>, transform_indices = @transform_5, window_bounds = array<i64: 128, 128>}, {pipeline_mode = #tpu.pipeline_mode<synchronous>, transform_indices = @transform_6, window_bounds = array<i64: 1, 128>}, {transform_indices = @transform_7, window_bounds = array<i64: 8, 128>}]} {
    %c0 = arith.constant 0 : index
    %c0_0 = arith.constant 0 : index
    %0 = vector.load %arg1[%c0, %c0_0] : memref<8x64xf32, #tpu.memory_space<vmem>>, vector<8x64xf32>
    %c0_1 = arith.constant 0 : index
    %c0_2 = arith.constant 0 : index
    %1 = vector.load %arg2[%c0_1, %c0_2] : memref<64x256xf32, #tpu.memory_space<vmem>>, vector<64x256xf32>
    %cst = arith.constant dense<0.000000e+00> : vector<8x256xf32>
    %2 = tpu.matmul %0, %1, %cst {dimension_numbers = #tpu.dot_dimension_numbers<[1], [0], [0], [1], [0, 0, 1, 1], [], []>} : vector<8x64xf32>, vector<64x256xf32>, vector<8x256xf32> -> vector<8x256xf32>
    %c0_3 = arith.constant 0 : index
    %c0_4 = arith.constant 0 : index
    %3 = vector.load %arg3[%c0_3, %c0_4] : memref<1x256xf32, #tpu.memory_space<vmem>>, vector<1x256xf32>
    %4 = vector.broadcast %3 : vector<1x256xf32> to vector<8x256xf32>
    %5 = arith.addf %2, %4 : vector<8x256xf32>
    %cst_5 = arith.constant 2.000000e-01 : f32
    %6 = vector.broadcast %cst_5 : f32 to vector<8x256xf32>
    %7 = arith.mulf %6, %5 : vector<8x256xf32>
    %8 = arith.maximumf %5, %7 : vector<8x256xf32>
    %c0_6 = arith.constant 0 : index
    %c0_7 = arith.constant 0 : index
    %9 = vector.load %arg4[%c0_6, %c0_7] : memref<256x128xf32, #tpu.memory_space<vmem>>, vector<256x128xf32>
    %cst_8 = arith.constant dense<0.000000e+00> : vector<8x128xf32>
    %10 = tpu.matmul %8, %9, %cst_8 {dimension_numbers = #tpu.dot_dimension_numbers<[1], [0], [0], [1], [0, 0, 1, 1], [], []>} : vector<8x256xf32>, vector<256x128xf32>, vector<8x128xf32> -> vector<8x128xf32>
    %c0_9 = arith.constant 0 : index
    %c0_10 = arith.constant 0 : index
    %11 = vector.load %arg5[%c0_9, %c0_10] : memref<1x128xf32, #tpu.memory_space<vmem>>, vector<1x128xf32>
    %12 = vector.broadcast %11 : vector<1x128xf32> to vector<8x128xf32>
    %13 = arith.addf %10, %12 : vector<8x128xf32>
    %cst_11 = arith.constant 2.000000e-01 : f32
    %14 = vector.broadcast %cst_11 : f32 to vector<8x128xf32>
    %15 = arith.mulf %14, %13 : vector<8x128xf32>
    %16 = arith.maximumf %13, %15 : vector<8x128xf32>
    %c0_12 = arith.constant 0 : index
    %c0_13 = arith.constant 0 : index
    %17 = vector.load %arg6[%c0_12, %c0_13] : memref<128x128xf32, #tpu.memory_space<vmem>>, vector<128x128xf32>
    %cst_14 = arith.constant dense<0.000000e+00> : vector<8x128xf32>
    %18 = tpu.matmul %16, %17, %cst_14 {dimension_numbers = #tpu.dot_dimension_numbers<[1], [0], [0], [1], [0, 0, 1, 1], [], []>} : vector<8x128xf32>, vector<128x128xf32>, vector<8x128xf32> -> vector<8x128xf32>
    %c0_15 = arith.constant 0 : index
    %c0_16 = arith.constant 0 : index
    %19 = vector.load %arg7[%c0_15, %c0_16] : memref<1x128xf32, #tpu.memory_space<vmem>>, vector<1x128xf32>
    %20 = vector.broadcast %19 : vector<1x128xf32> to vector<8x128xf32>
    %21 = arith.addf %18, %20 : vector<8x128xf32>
    %22 = tpu.iota {dimensions = array<i32: 1>} : vector<8x128xi32>
    %c6_i32 = arith.constant 6 : i32
    %23 = vector.broadcast %c6_i32 : i32 to vector<8x128xi32>
    %24 = arith.cmpi slt, %22, %23 : vector<8x128xi32>
    %25 = arith.mulf %21, %21 : vector<8x128xf32>
    %cst_17 = arith.constant 0.000000e+00 : f32
    %26 = vector.broadcast %cst_17 : f32 to vector<8x128xf32>
    %27 = arith.select %24, %25, %26 : vector<8x128xi1>, vector<8x128xf32>
    %cst_18 = arith.constant dense<0.000000e+00> : vector<8xf32>
    %28 = vector.multi_reduction <add>, %27, %cst_18 [1] : vector<8x128xf32> to vector<8xf32>
    %29 = vector.shape_cast %28 : vector<8xf32> to vector<8x1xf32>
    %30 = math.rsqrt %29 : vector<8x1xf32>
    %31 = vector.broadcast %30 : vector<8x1xf32> to vector<8x128xf32>
    %32 = arith.mulf %21, %31 : vector<8x128xf32>
    %33 = arith.select %24, %32, %21 : vector<8x128xi1>, vector<8x128xf32>
    %c0_19 = arith.constant 0 : index
    %c0_20 = arith.constant 0 : index
    %34 = vector.load %arg8[%c0_19, %c0_20] : memref<8x128xf32, #tpu.memory_space<vmem>>, vector<8x128xf32>
    tpu.vector_store %arg8[%c0_19, %c0_20], %33 {strides = array<i32>} : memref<8x128xf32, #tpu.memory_space<vmem>>, vector<8x128xf32>,
    return
  }
  func.func @transform_0(%arg0: i32) -> (i32, i32) {
    %c0_i32 = arith.constant 0 : i32
    %c0_i32_0 = arith.constant 0 : i32
    return %arg0, %c0_i32 : i32, i32
  }
  func.func @transform_1(%arg0: i32) -> (i32, i32) {
    %c0_i32 = arith.constant 0 : i32
    %c0_i32_0 = arith.constant 0 : i32
    %c0_i32_1 = arith.constant 0 : i32
    return %c0_i32, %c0_i32_0 : i32, i32
  }
  func.func @transform_2(%arg0: i32) -> (i32, i32) {
    %c0_i32 = arith.constant 0 : i32
    %c0_i32_0 = arith.constant 0 : i32
    %c0_i32_1 = arith.constant 0 : i32
    return %c0_i32, %c0_i32_0 : i32, i32
  }
  func.func @transform_3(%arg0: i32) -> (i32, i32) {
    %c0_i32 = arith.constant 0 : i32
    %c0_i32_0 = arith.constant 0 : i32
    %c0_i32_1 = arith.constant 0 : i32
    return %c0_i32, %c0_i32_0 : i32, i32
  }
  func.func @transform_4(%arg0: i32) -> (i32, i32) {
    %c0_i32 = arith.constant 0 : i32
    %c0_i32_0 = arith.constant 0 : i32
    %c0_i32_1 = arith.constant 0 : i32
    return %c0_i32, %c0_i32_0 : i32, i32
  }
  func.func @transform_5(%arg0: i32) -> (i32, i32) {
    %c0_i32 = arith.constant 0 : i32
    %c0_i32_0 = arith.constant 0 : i32
    %c0_i32_1 = arith.constant 0 : i32
    return %c0_i32, %c0_i32_0 : i32, i32
  }
  func.func @transform_6(%arg0: i32) -> (i32, i32) {
    %c0_i32 = arith.constant 0 : i32
    %c0_i32_0 = arith.constant 0 : i32
    %c0_i32_1 = arith.constant 0 : i32
    return %c0_i32, %c0_i32_0 : i32, i32
  }
  func.func @transform_7(%arg0: i32) -> (i32, i32) {
    %c0_i32 = arith.constant 0 : i32
    %c0_i32_0 = arith.constant 0 : i32
    return %arg0, %c0_i32 : i32, i32
  }
}

</mosaic_0001>

<bundles_post_ra>
// kernel: tpu_custom_call.1
= control target key start
LH: loop header
LB: loop body
LE: loop exit
PB: predicated region body
PF: predicated region fallthrough
CT: control target
= control target key end

     0   :  { %s1415_s0 = inlined_call_operand.hbm [shape: f32[16,64], index: 0, kind: input, shape index: {}]   ;;  %s1416_s1 = inlined_call_operand.hbm [shape: f32[64,256], index: 1, kind: input, shape index: {}]   ;;  %s1417_s2 = inlined_call_operand.vmem [shape: f32[1,256], index: 2, kind: input, shape index: {}]   ;;  %s1418_s3 = inlined_call_operand.hbm [shape: f32[256,128], index: 3, kind: input, shape index: {}]   ;;  %s1419_s4 = inlined_call_operand.vmem [shape: f32[1,128], index: 4, kind: input, shape index: {}]   ;;  %s1420_s5 = inlined_call_operand.hbm [shape: f32[128,128], index: 5, kind: input, shape index: {}]   ;;  %s1421_s6 = inlined_call_operand.vmem [shape: f32[1,128], index: 6, kind: input, shape index: {}]   ;;  %s1422_s7 = inlined_call_operand.hbm [shape: f32[16,128], index: 7, kind: output, shape index: {}]  }
   0x1   :  { %1427 = sst [smem:[#allocation15_spill]] %s1416_s1 }
   0x2   :  { %1428 = sst [smem:[#allocation16_spill]] %s1418_s3 }
   0x3   :  { %12 = vsyncpa [#allocation3], 0 }
   0x4   :  { %14 = vsyncpa [#allocation3 + $0x1], 0 }
   0x5   :  { %15 = vsyncpa [#allocation6], 0 }
   0x6   :  { %16 = vsyncpa [#allocation9], 0 }
   0x7   :  { %17 = vsyncpa [#allocation4], 0 }
   0x8   :  { %19 = vsyncpa [#allocation4 + $0x1], 0  ;;  %s1198_s24 = smov 0   ;;  %s1200_s25 = smov 0  }
   0x9   :  { %s1202_s26 = smov 0   ;;  %s1204_s27 = smov 0  }
   0xa LB: > { %s1219_s28 = sadd.s32 4294967295, %s1145_s27   ;;  %s774_s29 = sadd.s32 4294967294, %s1145_s27   ;;  %s1145_s27 = sphi %s1204_s27, %s1450_s27   ;;  %s1141_s26 = sphi %s1202_s26, %s1449_s26   ;;  %s1137_s25 = sphi %s1200_s25, %s1448_s25   ;;  %s1133_s24 = sphi %s1198_s24, %s1447_s24  }
   0xb   : > { %p45_p0 = scmp.ne.s32.totalorder %s1137_s25, %s1133_s24  ;;  %p1423_p1 = scmp.eq.s32.totalorder %s1219_s28, 0 }
   0xc   : > { %p201_p3 = scmp.eq.s32.totalorder %s774_s29, 1  ;;  %p775_p5 = scmp.ge.s32.totalorder %s1145_s27, 1 }
   0xd   : > { %p1228_p4 = por %p1423_p1, %p45_p0  ;;  %p208_p7 = scmp.lt.s32.totalorder %s1145_s27, 3 }
   0xe   : > { %p1233_p6 = por %p201_p3, %p45_p0  ;;  %s1147_s10 = smov [#allocation5]  }
   0xf   : > { %s1429_s30 = scalar_select %p1228_p4, 1, 0 }
  0x10   : > { %s1430_s8 = scalar_select %p1233_p6, 1, 0 }
  0x11   : > { %p1238_p8 = pnand %p775_p5, %p208_p7  ;;  %s220_s11 = sshll.u32 %s1147_s10, 4  ;;  %s221_s11 = int_to_ptr.vmem [resolvable:$true] %s220_s11 }
  0x12   : > { %s1148_s13 = smov [#allocation7]   ;;  %s978_s15 = scalar_lea.vmem %s221_s11, 2048 }
  0x13   : > { %s1431_s9 = scalar_select %p1238_p8, 1, 0 }
  0x14   : > { %p898_p9 = pneg %p1238_p8  ;;  %s236_s14 = sshll.u32 %s1148_s13, 4  ;;  %s237_s14 = int_to_ptr.vmem [resolvable:$true] %s236_s14 }
  0x15   : > { %p979_p13 = scmp.ne.s32.totalorder %s221_s11, %s978_s15  ;;  %p986_p5 = scmp.lt.s32.totalorder %s221_s11, %s221_s11 }
  0x16   : > { %p1247_p11 = pnand %p898_p9, %p1423_p1  ;;  %p987_p7 = scmp.lt.s32.totalorder %s978_s15, %s978_s15 }
  0x18   : > { %p969_p12 = pneg %p1247_p11  ;;  %p988_p10 = por %p987_p7, %p986_p5 }
  0x1a   : > { %p981_p0 = pnand %p979_p13, %p969_p12 }
  0x1c   : > { %p982_p3 = pneg %p981_p0 }
  0x1e   : > { %p989_p9 = pnand %p988_p10, %p982_p3 }
  0x20   : > { %992 = shalt.err (!%p989_p9)
}
  0x21   : > { %s1149_s16 = smov 256   ;;  %s1150_s17 = smov 16  }
  0x22   : > { %s1433_s1 = sld [smem:[#allocation15_spill]]  ;;  %s1004_s20 = scalar_lea.vmem %s237_s14, 4096 }
  0x23   : > { %p1005_p1 = scmp.ne.s32.totalorder %s237_s14, %s1004_s20  ;;  %p1012_p2 = scmp.lt.s32.totalorder %s237_s14, %s237_s14 }
  0x24   : > { %p1013_p6 = scmp.lt.s32.totalorder %s1004_s20, %s1004_s20 }
  0x25   : > { %p1007_p13 = pnand %p1005_p1, %p969_p12 }
  0x26   : > { %p1014_p5 = por %p1013_p6, %p1012_p2 }
  0x27   : > { %p1008_p0 = pneg %p1007_p13 }
  0x28   : > { %901 = dma.hbm_to_vmem [thread:$0]  (!%p1247_p11), %s1433_s1, 2048, %s221_s11, [#allocation6], %s1149_s16, %s1149_s16, %s1150_s17  }
  0x29   : > { %p1015_p10 = pnand %p1014_p5, %p1008_p0 }
  0x2b   : > { %1018 = shalt.err (!%p1015_p10)
}
  0x2c   : > { %s1151_s21 = smov 128   ;;  %s1152_s22 = smov 8  }
  0x2d   : > { %s1434_s3 = sld [smem:[#allocation16_spill]]  ;;  %s1153_s10 = smov [#allocation8]  }
  0x2e   : > { %s252_s11 = sshll.u32 %s1153_s10, 4  ;;  %s1270_s13 = sadd.s32 1, %s1145_s27   ;;  %s253_s11 = int_to_ptr.vmem [resolvable:$true] %s252_s11 }
  0x2f   : > { %s1030_s15 = scalar_lea.vmem %s253_s11, 2048  ;;  %p1038_p3 = scmp.lt.s32.totalorder %s253_s11, %s253_s11 }
  0x30   : > { %p1031_p1 = scmp.ne.s32.totalorder %s253_s11, %s1030_s15  ;;  %p1039_p7 = scmp.lt.s32.totalorder %s1030_s15, %s1030_s15 }
  0x32   : > { %p1033_p2 = pnand %p1031_p1, %p969_p12  ;;  %p1040_p9 = por %p1039_p7, %p1038_p3 }
  0x33   : > { %904 = dma.hbm_to_vmem [thread:$0]  (!%p1247_p11), %s1434_s3, 4096, %s237_s14, [#allocation6], %s1151_s21, %s1151_s21, %s1152_s22  }
  0x34   : > { %p1034_p6 = pneg %p1033_p2 }
  0x36   : > { %p1041_p13 = pnand %p1040_p9, %p1034_p6 }
  0x38   : > { %1044 = shalt.err (!%p1041_p13)
}
  0x39   : > { %907 = dma.hbm_to_vmem [thread:$0]  (!%p1247_p11), %s1420_s5, 2048, %s253_s11, [#allocation9], %s1151_s21, %s1151_s21, %s1152_s22  }
  0x3a   : > { %s29_s17 = ssub.s32 %s1145_s27, %s1270_s13  ;;  %s32_s18 = sadd.s32 1, %s1141_s26 }
  0x3b   : > { %p30_p12 = scmp.eq.s32.totalorder %s29_s17, 0  ;;  %p39_p0 = scmp.ne.s32.totalorder %s1141_s26, %s1137_s25 }
  0x3c   : > { %p40_p5 = scmp.eq.s32.totalorder %s1145_s27, 0  ;;  %p919_p10 = scmp.lt.s32.totalorder %s1145_s27, 2 }
  0x3d   : > { %s1288_s12 = scalar_select %p30_p12, %s1141_s26, %s32_s18  }
  0x3e   : > { %p41_p1 = por %p40_p5, %p39_p0  ;;  %p1435_p2 = scmp.eq.s32.totalorder %s1219_s28, 1 }
  0x3f   : > { %s269_s20 = sand.u32 1, %s1141_s26   ;;  %s781_s23 = sshll.u32 %s1145_s27, 7 }
  0x40   : > { %p1292_p6 = por %p1435_p2, %p39_p0  ;;  %s780_s29 = sshll.u32 %s269_s20, 3 }
  0x41   : > { %s1301_s21 = scalar_lea.hbm %s1415_s0, %s781_s23  ;;  %s273_s22 = scalar_lea.vmem [#allocation2], %s780_s29 }
  0x42   : > { %s1436_s19 = scalar_select %p1292_p6, 1, 0 }
  0x43   : > { %s280_s11 = sshll.u32 %s273_s22, 4  ;;  %p1303_p11 = pnand %p919_p10, %p41_p1  ;;  %s281_s11 = int_to_ptr.vmem [resolvable:$true] %s280_s11 }
  0x44   : > { %s270_s14 = scalar_lea.sflag [#allocation3], %s269_s20  ;;  %s1045_s17 = scalar_lea.hbm %s1301_s21, 128 }
  0x45   : > { %p1046_p3 = scmp.ne.s32.totalorder %s1301_s21, %s1045_s17  ;;  %p1047_p7 = pneg %p1303_p11 }
  0x46   : > { %s1050_s10 = scalar_lea.hbm %s1415_s0, 256  ;;  %p1051_p12 = scmp.lt.s32.totalorder %s1301_s21, %s1415_s0 }
  0x47   : > { %p1048_p9 = pnand %p1047_p7, %p1046_p3  ;;  %p1052_p0 = scmp.lt.s32.totalorder %s1050_s10, %s1045_s17 }
  0x49   : > { %p1049_p13 = pneg %p1048_p9  ;;  %p1053_p5 = por %p1052_p0, %p1051_p12 }
  0x4b   : > { %p1054_p10 = pnand %p1053_p5, %p1049_p13 }
  0x4d   : > { %1057 = shalt.err (!%p1054_p10)
}
  0x4e   : > { %s1058_s22 = scalar_lea.vmem %s281_s11, 128  ;;  %s1154_s20 = smov [#allocation2]  }
  0x4f   : > { %p1059_p1 = scmp.ne.s32.totalorder %s281_s11, %s1058_s22  ;;  %s1063_s1 = sshll.u32 %s1154_s20, 4  ;;  %s1064_s1 = int_to_ptr.vmem [resolvable:$false] %s1063_s1 }
  0x50   : > { %s1065_s3 = scalar_lea.vmem %s1064_s1, 256  ;;  %p1066_p3 = scmp.lt.s32.totalorder %s281_s11, %s1064_s1 }
  0x51   : > { %p1061_p2 = pnand %p1059_p1, %p1047_p7  ;;  %p1067_p9 = scmp.lt.s32.totalorder %s1065_s3, %s1058_s22 }
  0x53   : > { %p1062_p6 = pneg %p1061_p2  ;;  %p1068_p4 = por %p1067_p9, %p1066_p3 }
  0x55   : > { %p1069_p8 = pnand %p1068_p4, %p1062_p6 }
  0x57   : > { %1072 = shalt.err (!%p1069_p8)
}
  0x58   : > { %911 = dma.hbm_to_vmem [thread:$0]  (!%p1303_p11), %s1301_s21, 128, %s281_s11, %s270_s14  }
  0x59   : > { %p1438_p13 = scmp.ne.s32.totalorder %s1431_s9, 0 }
  0x5a   : > { %s1324_s17 = sand.u32 (!%p1438_p13), 1, %s1137_s25   ;;  %p1439_p4 = scmp.ne.s32.totalorder (!%p1438_p13), %s1429_s30, 0 }
  0x5b   : > { %289 = sbr.rel (%p1438_p13) target bundleno = 892 (0x37c), region = 48  ;;  %s783_s18 = sshll.u32 (!%p1438_p13), %s1324_s17, 3 }
  0x5c   : > { %s292_s1 = scalar_lea.sflag (!%p1438_p13), [#allocation3], %s1324_s17  ;;  %s1330_s3 = scalar_lea.vmem (!%p1438_p13), [#allocation2], %s783_s18 }
  0x60   : > { %1116 = dma.done.wait (%p1439_p4), %s292_s1, 128  }
  0x61   : > { %1118 = vsyncadd (%p1439_p4), %s292_s1, 4294967168  ;;  %p1440_p8 = scmp.eq.s32.totalorder %s1219_s28, 0 }
  0x63   : > { %1120 = dma.done.wait (%p1440_p8), [#allocation6], 6144   ;;  %p1441_p6 = pmov %p1440_p8 }
  0x65   : > { %1122 = vsyncadd (%p1441_p6), [#allocation6], 4294961152  ;;  %p1442_p11 = pmov %p1441_p6 }
  0x66   : > { %p1443_p7 = pmov %p1441_p6 }
  0x67   : > { %1124 = dma.done.wait (%p1442_p11), [#allocation9], 2048  }
  0x68   : > { %1126 = vsyncadd (%p1443_p7), [#allocation9], 4294965248  ;;  %v1155_v0 = vmov 0.0   ;;  %v354_v1 = vld [vmem:[#allocation5 + $0x78] sm:$0xff]  ;;  %v353_v2 = vld [vmem:[#allocation5 + $0x70] sm:$0xff]  ;;  %vm367_vm0 = vcmask 523264   ;;  %v357_v60 = vlaneseq }
  0x69   : > { %435 = vmatprep.mubr.f32.mxu0 %v1155_v0  ;;  %v352_v3 = vld [vmem:[#allocation5 + $0x68] sm:$0xff]  ;;  %387 = vmatprep.subr.mxu0 %v354_v1  ;;  %v351_v4 = vld [vmem:[#allocation5 + $0x60] sm:$0xff]  ;;  %v350_v5 = vld [vmem:[#allocation5 + $0x58] sm:$0xff]  ;;  %vm1156_vm1 = vmmov 0   ;;  %s792_s23 = sshll.u32 %s1219_s28, 7  ;;  %s337_s10 = scalar_lea.vmem [#allocation10], %s783_s18 }
  0x6a   : > { %388 = vmatpush1.msra.mxu0 %v353_v2  ;;  %v349_v6 = vld [vmem:[#allocation5 + $0x50] sm:$0xff]  ;;  %v348_v7 = vld [vmem:[#allocation5 + $0x48] sm:$0xff]  ;;  %v347_v8 = vld [vmem:[#allocation5 + $0x40] sm:$0xff]  ;;  %v358_v61 = vshrl.u32 %v357_v60, 7  ;;  %s675_s15 = sshll.u32 %s337_s10, 4  ;;  %s1378_s20 = scalar_lea.hbm %s1422_s7, %s792_s23  ;;  %s676_s15 = int_to_ptr.vmem [resolvable:$true] %s675_s15 }
  0x6b   : > { %389 = vmatprep.subr.mxu0 %v352_v3  ;;  %v346_v9 = vld [vmem:[#allocation5 + $0x38] sm:$0xff]  ;;  %v476_v12 = vld [vmem:[#allocation7 + $0xf0] sm:$0xff]  ;;  %v475_v15 = vld [vmem:[#allocation7 + $0xe8] sm:$0xff]  ;;  %s662_s1 = scalar_lea.sflag [#allocation4], %s1324_s17  ;;  %p1444_p0 = scmp.ne.s32.totalorder %s1436_s19, 0 }
  0x6c   : > { %390 = vmatpush1.msra.mxu0 %v351_v4  ;;  %v477_v10 = vld [vmem:[#allocation7 + $0xf8] sm:$0xff]  ;;  %v460_v13 = vld [vmem:[#allocation7 + $0x70] sm:$0xff]  ;;  %v344_v16 = vld [vmem:[#allocation5 + $0x28] sm:$0xff]  ;;  %v359_v62 = vsub.s32 0, %v358_v61  ;;  %v363_v1 = vsub.s32 1, %v358_v61  ;;  %s1157_s28 = smov [#allocation10]  }
  0x6d   : > { %391 = vmatprep.subr.mxu0 %v350_v5  ;;  %795 = vmatprep.subr.mxu1 %v477_v10  ;;  %v461_v11 = vld [vmem:[#allocation7 + $0x78] sm:$0xff]  ;;  %v345_v14 = vld [vmem:[#allocation5 + $0x30] sm:$0xff]  ;;  %v459_v17 = vld [vmem:[#allocation7 + $0x68] sm:$0xff]  ;;  %s1077_s30 = sshll.u32 %s1157_s28, 4  ;;  %s1078_s30 = int_to_ptr.vmem [resolvable:$false] %s1077_s30 }
  0x6e   : > { %392 = vmatpush1.msra.mxu0 %v349_v6  ;;  %796 = vmatpush3.msra.mxu1 %v461_v11  ;;  %v343_v18 = vld [vmem:[#allocation5 + $0x20] sm:$0xff]  ;;  %v342_v20 = vld [vmem:[#allocation5 + $0x18] sm:$0xff]  ;;  %v341_v22 = vld [vmem:[#allocation5 + $0x10] sm:$0xff]  ;;  %s1079_s18 = scalar_lea.vmem %s1078_s30, 256  ;;  %p1080_p1 = scmp.lt.s32.totalorder %s676_s15, %s1078_s30 }
  0x6f   : > { %393 = vmatprep.subr.mxu0 %v348_v7  ;;  %797 = vmatprep.subr.mxu1 %v476_v12  ;;  %v474_v19 = vld [vmem:[#allocation7 + $0xe0] sm:$0xff]  ;;  %v473_v23 = vld [vmem:[#allocation7 + $0xd8] sm:$0xff]  ;;  %v340_v24 = vld [vmem:[#allocation5 + $0x8] sm:$0xff] }
  0x70   : > { %394 = vmatpush1.msra.mxu0 %v347_v8  ;;  %798 = vmatpush3.msra.mxu1 %v460_v13  ;;  %v458_v21 = vld [vmem:[#allocation7 + $0x60] sm:$0xff]  ;;  %v457_v25 = vld [vmem:[#allocation7 + $0x58] sm:$0xff]  ;;  %v472_v27 = vld [vmem:[#allocation7 + $0xd0] sm:$0xff] }
  0x71   : > { %395 = vmatprep.subr.mxu0 %v346_v9  ;;  %799 = vmatprep.subr.mxu1 %v475_v15  ;;  %v339_v26 = vld [vmem:[#allocation5] sm:$0xff]  ;;  %v338_v28 = vld [vmem:[%s1330_s3] sm:$0xff]  ;;  %v471_v30 = vld [vmem:[#allocation7 + $0xc8] sm:$0xff]  ;;  %s1073_s3 = scalar_lea.vmem %s676_s15, 128 }
  0x72   : > { %396 = vmatpush1.msra.mxu0 %v345_v14  ;;  %800 = vmatpush3.msra.mxu1 %v459_v17  ;;  %v456_v29 = vld [vmem:[#allocation7 + $0x50] sm:$0xff]  ;;  %v455_v31 = vld [vmem:[#allocation7 + $0x48] sm:$0xff]  ;;  %v470_v32 = vld [vmem:[#allocation7 + $0xc0] sm:$0xff]  ;;  %p1074_p12 = scmp.ne.s32.totalorder %s676_s15, %s1073_s3  ;;  %p1081_p2 = scmp.lt.s32.totalorder %s1079_s18, %s1073_s3 }
  0x73   : > { %397 = vmatprep.subr.mxu0 %v344_v16  ;;  %801 = vmatprep.subr.mxu1 %v474_v19  ;;  %v454_v33 = vld [vmem:[#allocation7 + $0x40] sm:$0xff]  ;;  %v469_v34 = vld [vmem:[#allocation7 + $0xb8] sm:$0xff]  ;;  %v468_v36 = vld [vmem:[#allocation7 + $0xb0] sm:$0xff] }
  0x74   : > { %398 = vmatpush1.msra.mxu0 %v343_v18  ;;  %802 = vmatpush3.msra.mxu1 %v458_v21  ;;  %v453_v35 = vld [vmem:[#allocation7 + $0x38] sm:$0xff]  ;;  %v452_v37 = vld [vmem:[#allocation7 + $0x30] sm:$0xff]  ;;  %v467_v38 = vld [vmem:[#allocation7 + $0xa8] sm:$0xff]  ;;  %p1075_p5 = pnand %p1074_p12, %p1444_p0  ;;  %p1082_p3 = por %p1081_p2, %p1080_p1 }
  0x75   : > { %399 = vmatprep.subr.mxu0 %v342_v20  ;;  %803 = vmatprep.subr.mxu1 %v473_v23  ;;  %v451_v39 = vld [vmem:[#allocation7 + $0x28] sm:$0xff]  ;;  %v466_v40 = vld [vmem:[#allocation7 + $0xa0] sm:$0xff]  ;;  %v465_v42 = vld [vmem:[#allocation7 + $0x98] sm:$0xff] }
  0x76   : > { %400 = vmatpush1.msra.mxu0 %v341_v22  ;;  %804 = vmatpush3.msra.mxu1 %v457_v25  ;;  %v450_v41 = vld [vmem:[#allocation7 + $0x20] sm:$0xff]  ;;  %v449_v43 = vld [vmem:[#allocation7 + $0x18] sm:$0xff]  ;;  %v464_v44 = vld [vmem:[#allocation7 + $0x90] sm:$0xff]  ;;  %p1076_p10 = pneg %p1075_p5 }
  0x77   : > { %401 = vmatprep.subr.mxu0 %v340_v24  ;;  %805 = vmatprep.subr.mxu1 %v472_v27  ;;  %v448_v45 = vld [vmem:[#allocation7 + $0x10] sm:$0xff]  ;;  %v463_v46 = vld [vmem:[#allocation7 + $0x88] sm:$0xff]  ;;  %v462_v48 = vld [vmem:[#allocation7 + $0x80] sm:$0xff] }
  0x78   : > { %402 = vmatpush1.msra.mxu0 %v339_v26  ;;  %806 = vmatpush3.msra.mxu1 %v456_v29  ;;  %v447_v47 = vld [vmem:[#allocation7 + $0x8] sm:$0xff]  ;;  %v446_v49 = vld [vmem:[#allocation7] sm:$0xff]  ;;  %v572_v50 = vld [vmem:[#allocation8 + $0x78] sm:$0xff]  ;;  %v651_v26 = vand.u32 127, %v357_v60  ;;  %p1083_p9 = pnand %p1082_p3, %p1076_p10 }
  0x79   : > { %788 = vmatmul.mubr.msk.f32.vlgmr.msra.gmra.mxu0 %vm367_vm0, %v338_v28  ;;  %807 = vmatprep.subr.mxu1 %v471_v30  ;;  %v571_v51 = vld [vmem:[#allocation8 + $0x70] sm:$0xff]  ;;  %v570_v52 = vld [vmem:[#allocation8 + $0x68] sm:$0xff]  ;;  %v569_v53 = vld [vmem:[#allocation8 + $0x60] sm:$0xff] }
  0x7a   : > { %847 = vmatprep.subr.mxu0 %v1155_v0  ;;  %808 = vmatpush3.msra.mxu1 %v455_v31  ;;  %v568_v54 = vld [vmem:[#allocation8 + $0x58] sm:$0xff]  ;;  %v567_v55 = vld [vmem:[#allocation8 + $0x50] sm:$0xff]  ;;  %v566_v56 = vld [vmem:[#allocation8 + $0x48] sm:$0xff]  ;;  %vm652_vm2 = vcmp.lt.s32.totalorder %v651_v26, 6 }
  0x7b   : > { %809 = vmatprep.subr.mxu1 %v470_v32  ;;  %848 = vmatpush3.msra.mxu0 %v572_v50  ;;  %v565_v57 = vld [vmem:[#allocation8 + $0x40] sm:$0xff]  ;;  %v564_v58 = vld [vmem:[#allocation8 + $0x38] sm:$0xff]  ;;  %v563_v59 = vld [vmem:[#allocation8 + $0x30] sm:$0xff] }
  0x7c   : > { %810 = vmatpush3.msra.mxu1 %v454_v33  ;;  %849 = vmatprep.subr.mxu0 %v1155_v0  ;;  %v355_v63 = vld [vmem:[%s1417_s2] sm:$0x3]  ;;  %v562_v12 = vld [vmem:[#allocation8 + $0x28] sm:$0xff]  ;;  %v561_v13 = vld [vmem:[#allocation8 + $0x20] sm:$0xff] }
  0x7d   : > { %811 = vmatprep.subr.mxu1 %v469_v34  ;;  %850 = vmatpush3.msra.mxu0 %v571_v51  ;;  %v360_v2 = vrot.slane %v355_v63, %v359_v62  ;;  %v364_v3 = vrot.slane %v355_v63, %v363_v1  ;;  %v560_v14 = vld [vmem:[#allocation8 + $0x18] sm:$0xff]  ;;  %v559_v15 = vld [vmem:[#allocation8 + $0x10] sm:$0xff]  ;;  %v558_v16 = vld [vmem:[#allocation8 + $0x8] sm:$0xff] }
  0x7e   : > { %812 = vmatpush3.msra.mxu1 %v453_v35  ;;  %851 = vmatprep.subr.mxu0 %v1155_v0  ;;  %v557_v17 = vld [vmem:[#allocation8] sm:$0xff]  ;;  %v789_v19 = vld [vmem:[%s1419_s4] ss:$0 sm:$0xff] }
  0x7f   : > { %813 = vmatprep.subr.mxu1 %v468_v36  ;;  %852 = vmatpush3.msra.mxu0 %v570_v52  ;;  %v790_v25 = vld [vmem:[%s1421_s6] ss:$0 sm:$0xff] }
  0x80   : > { %814 = vmatpush3.msra.mxu1 %v452_v37  ;;  %853 = vmatprep.subr.mxu0 %v1155_v0 }
  0x81   : > { %815 = vmatprep.subr.mxu1 %v467_v38  ;;  %854 = vmatpush3.msra.mxu0 %v569_v53 }
  0x82   : > { %816 = vmatpush3.msra.mxu1 %v451_v39  ;;  %855 = vmatprep.subr.mxu0 %v1155_v0 }
  0x83   : > { %817 = vmatprep.subr.mxu1 %v466_v40  ;;  %856 = vmatpush3.msra.mxu0 %v568_v54 }
  0x84   : > { %818 = vmatpush3.msra.mxu1 %v450_v41  ;;  %857 = vmatprep.subr.mxu0 %v1155_v0 }
  0x85   : > { %819 = vmatprep.subr.mxu1 %v465_v42  ;;  %858 = vmatpush3.msra.mxu0 %v567_v55 }
  0x86   : > { %820 = vmatpush3.msra.mxu1 %v449_v43  ;;  %859 = vmatprep.subr.mxu0 %v1155_v0 }
  0x87   : > { %821 = vmatprep.subr.mxu1 %v464_v44  ;;  %860 = vmatpush3.msra.mxu0 %v566_v56 }
  0x88   : > { %822 = vmatpush3.msra.mxu1 %v448_v45  ;;  %861 = vmatprep.subr.mxu0 %v1155_v0 }
  0x89   : > { %823 = vmatprep.subr.mxu1 %v463_v46  ;;  %862 = vmatpush3.msra.mxu0 %v565_v57 }
  0x8a   : > { %824 = vmatpush3.msra.mxu1 %v447_v47  ;;  %863 = vmatprep.subr.mxu0 %v1155_v0 }
  0x8b   : > { %825 = vmatprep.subr.mxu1 %v462_v48  ;;  %864 = vmatpush3.msra.mxu0 %v564_v58 }
  0x8c   : > { %826 = vmatpush3.msra.mxu1 %v446_v49  ;;  %865 = vmatprep.subr.mxu0 %v1155_v0 }
  0x8d   : > { %866 = vmatpush3.msra.mxu0 %v563_v59  ;;  %879 = vmatprep.mubr.msk.f32.mxu0 %vm1156_vm1, %v1155_v0 }
  0x8e   : > { %867 = vmatprep.subr.mxu0 %v1155_v0 }
  0x8f   : > { %868 = vmatpush3.msra.mxu0 %v562_v12 }
  0x90   : > { %869 = vmatprep.subr.mxu0 %v1155_v0 }
  0x91   : > { %870 = vmatpush3.msra.mxu0 %v561_v13 }
  0x92   : > { %871 = vmatprep.subr.mxu0 %v1155_v0 }
  0x93   : > { %872 = vmatpush3.msra.mxu0 %v560_v14 }
  0x94   : > { %873 = vmatprep.subr.mxu0 %v1155_v0 }
  0x95   : > { %874 = vmatpush3.msra.mxu0 %v559_v15 }
  0x96   : > { %875 = vmatprep.subr.mxu0 %v1155_v0 }
  0x97   : > { %876 = vmatpush3.msra.mxu0 %v558_v16 }
  0x98   : > { %877 = vmatprep.subr.mxu0 %v1155_v0 }
  0x99   : > { %878 = vmatpush3.msra.mxu0 %v557_v17 }
 0x139   : > { %v437_v4 = vpop.f32.mrf.mxu0 }
 0x13a   : > { %v438_v5 = vadd.f32 %v437_v4, %v360_v2 }
 0x13b   : > { %v439_v6 = vpop.f32.mrf.mxu0 }
 0x13c   : > { %v440_v7 = vadd.f32 %v439_v6, %v364_v3  ;;  %v442_v8 = vmul.f32 0.2, %v438_v5 }
 0x13e   : > { %v443_v9 = vmul.f32 0.2, %v440_v7  ;;  %v444_v11 = vmax.f32 %v438_v5, %v442_v8 }
 0x140   : > { %v445_v10 = vmax.f32 %v440_v7, %v443_v9 }
 0x142   : > { %549 = vmatprep.mubr.f32.mxu1 %v445_v10 }
 0x143   : > { %550 = vmatmul.mubr.f32.vlgmr.msra.gmra.mxu1 %v444_v11 }
 0x203   : > { %v827_v18 = vpop.f32.mrf.mxu1 }
 0x205   : > { %v828_v20 = vpop.f32.mrf.mxu1 }
 0x206   : > { %v829_v21 = vadd.f32 %v828_v20, %v827_v18 }
 0x208   : > { %v552_v22 = vadd.f32 %v829_v21, %v789_v19 }
 0x20a   : > { %v555_v23 = vmul.f32 0.2, %v552_v22 }
 0x20c   : > { %v556_v24 = vmax.f32 %v552_v22, %v555_v23 }
 0x20e   : > { %880 = vmatmul.mubr.f32.vlgmr.msra.gmra.mxu0 %v556_v24 }
 0x2ce   : > { %v646_v27 = vpop.f32.mrf.mxu0 }
 0x2cf   : > { %v647_v0 = vadd.f32 %v790_v25, %v646_v27 }
 0x2d0   : > { %v881_v28 = vpop.f32.mrf.mxu0 }
 0x2d1   : > { %v653_v29 = vmul.f32 %v647_v0, %v647_v0 }
 0x2d3   : > { %v654_v30 = vsel %vm652_vm2, %v653_v29, 0.0 }
 0x2d4   : > { %655 = vadd.xlane.f32.xlu0 %v654_v30 }
 0x35d   : > { %v656_v31 = vpop.xlane.xlu0 %655 }
 0x35e   : > { %965 = vrsqrt.f32 %v656_v31 }
 0x36b   : > { %v966_v32 = vpop.eup %965 }
 0x36c   : > { %v658_v33 = vmul.f32 %v966_v32, %v647_v0 }
 0x36e   : > { %v659_v34 = vsel %vm652_vm2, %v658_v33, %v647_v0 }
 0x36f   : > { %660 = vst [vmem:[%s337_s10] sm:$0xff] %v659_v34 }
 0x370   : > { %1086 = shalt.err (!%p1083_p9)
}
 0x371   : > { %s1087_s9 = scalar_lea.hbm %s1378_s20, 128  ;;  %s1091_s11 = scalar_lea.hbm %s1422_s7, 256 }
 0x372   : > { %p1088_p13 = scmp.ne.s32.totalorder %s1378_s20, %s1087_s9  ;;  %p1092_p6 = scmp.lt.s32.totalorder %s1378_s20, %s1422_s7 }
 0x373   : > { %p1093_p11 = scmp.lt.s32.totalorder %s1091_s11, %s1087_s9 }
 0x374   : > { %p1089_p4 = pnand %p1088_p13, %p1444_p0 }
 0x375   : > { %p1094_p7 = por %p1093_p11, %p1092_p6 }
 0x376   : > { %p1090_p8 = pneg %p1089_p4 }
 0x378   : > { %p1095_p12 = pnand %p1094_p7, %p1090_p8 }
 0x37a   : > { %1098 = shalt.err (!%p1095_p12)
}
 0x37b   : > { %896 = dma.vmem_to_hbm [thread:$0]  (%p1444_p0), %s676_s15, 128, %s1378_s20, %s662_s1  }
 0x37c PF: > { %s687_s23 = sand.u32 1, %s1133_s24   ;;  %p1445_p5 = scmp.ne.s32.totalorder %s1430_s8, 0 }
 0x37d   : > { %p1446_p10 = scmp.ge.s32.totalorder %s1145_s27, 2  ;;  %s688_s10 = scalar_lea.sflag [#allocation4], %s687_s23 }
 0x37f   : > { %p913_p1 = pnand %p1446_p10, %p1445_p5 }
 0x381   : > { %p914_p2 = pneg %p913_p1 }
 0x383   : > { %1128 = dma.done.wait (%p914_p2), %s688_s10, 128  }
 0x384   : > { %1130 = vsyncadd (%p914_p2), %s688_s10, 4294967168  ;;  %p22_p3 = scmp.ge.s32.totalorder %s1270_s13, 4   ;;  %s1447_s24 = smov %s1137_s25 }
 0x385   : > { %s1448_s25 = smov %s1141_s26  ;;  %s1449_s26 = smov %s1288_s12 }
 0x386   : > { %s1450_s27 = smov %s1270_s13  ;;  %24 = sbr.rel (!%p22_p3) target bundleno = 10 (0xa), region = 105 }
 0x38b   :  { %693 = vsyncpa [#allocation3], 1 }
 0x38c   :  { %695 = vsyncpa [#allocation3 + $0x1], 1 }
 0x38d   :  { %696 = vsyncpa [#allocation6], 1 }
 0x38e   :  { %697 = vsyncpa [#allocation9], 1 }
 0x38f   :  { %698 = vsyncpa [#allocation4], 1 }
 0x390   :  { %700 = vsyncpa [#allocation4 + $0x1], 1 }

</bundles_post_ra>
